<compile_context>
chip_gen: v5e
topology: v5e:2x2
jax: 0.10.0
libtpu: 0.0.40
codegen_flags: <defaults>
</compile_context>

<pallas_src>
import functools
import math

import jax
import jax.numpy as jnp
from jax.experimental import pallas as pl
from jax.experimental.pallas import tpu as pltpu


def make_pos_encoding(d_model, maxlen, dtype=jnp.float32):
    """Same buffer as the PyTorch __init__: shape (maxlen, 1, d_model)."""
    pos = jnp.arange(maxlen, dtype=jnp.float32)[:, None]                    # (maxlen, 1)
    denom = jnp.exp(
        jnp.arange(0, d_model, 2, dtype=jnp.float32) * (-math.log(10000.0) / d_model)
    )                                                                        # (d_model/2,)
    pe = jnp.zeros((maxlen, d_model), dtype=jnp.float32)
    pe = pe.at[:, 0::2].set(jnp.sin(pos * denom))
    pe = pe.at[:, 1::2].set(jnp.cos(pos * denom))
    return pe[:, None, :].astype(dtype)                                      # (maxlen, 1, d_model)


# ---------------------------------------------------------------------------
# Kernels: pure same-shape elementwise work on lane-dense 2-D blocks.
# ---------------------------------------------------------------------------
def _add_pe_kernel(x_ref, pe_ref, o_ref):
    o_ref[...] = (x_ref[...] + pe_ref[...]).astype(o_ref.dtype)


def _add_pe_dropout_kernel(x_ref, pe_ref, bits_ref, o_ref, *, p):
    y = x_ref[...] + pe_ref[...]
    thresh = jnp.uint32(min(int(p * (2.0 ** 32)), 2 ** 32 - 1))
    keep = bits_ref[...] >= thresh                     # P(keep) = 1 - p
    scale = jnp.asarray(1.0 / (1.0 - p), dtype=y.dtype)
    o_ref[...] = jnp.where(keep, y * scale, jnp.zeros_like(y)).astype(o_ref.dtype)


# ---------------------------------------------------------------------------
# Tiling heuristics.
# ---------------------------------------------------------------------------
def _pick_batch_fold(B, D):
    """Smallest tb dividing B such that tb*D is a multiple of 128 (lane-dense)."""
    if D % 128 == 0:
        return 1
    for tb in range(1, B + 1):
        if B % tb == 0 and (tb * D) % 128 == 0:
            return tb
    return B  # best effort: lane dim == full B*D (full-extent block is always legal)


def _pick_seq_tile(S, row_bytes, sublane, target_bytes=4 << 20):
    """Largest seq tile that divides S, is sublane-aligned (or == S), and keeps one
    grid step's traffic near `target_bytes` so the pipeline has many steps without
    blowing the VMEM budget (double-buffered blocks stay well under 32 MiB)."""
    cap = max(1, target_bytes // max(row_bytes, 1))
    if S >= 8 * sublane:
        cap = min(cap, max(sublane, S // 8))           # keep >= ~8 grid steps along seq
    cap = min(cap, S)
    for ts in range(cap, 0, -1):
        if S % ts == 0 and (ts % sublane == 0 or ts == S):
            return ts
    return S


# ---------------------------------------------------------------------------
# Wrapper.
# ---------------------------------------------------------------------------
def positional_encoder(x, pos_encoding, *, p=0.1, train=False, seed=0):
    """x: (S, B, D) array.  pos_encoding: (maxlen, 1, D) with maxlen >= S."""
    S, B, D = x.shape
    assert pos_encoding.shape[0] >= S and pos_encoding.shape[-1] == D
    assert 0.0 <= p < 1.0

    dtype = x.dtype
    itemsize = jnp.dtype(dtype).itemsize
    sublane = max(8, 32 // itemsize)                   # 8 for f32, 16 for bf16

    tb = _pick_batch_fold(B, D)                        # batches folded into the lane axis
    lane = tb * D
    n_lane_blocks = B // tb

    # Free row-major reshape: (S, B, D) -> (S, B*D) lane-dense slab.
    x2 = x.reshape(S, B * D)

    # pos-encoding in x's dtype; tiled across the folded batches only when needed
    # (tb == 1 whenever d_model is already a multiple of 128).
    pe2 = pos_encoding[:S].reshape(S, D).astype(dtype)
    if tb > 1:
        pe2 = jnp.tile(pe2, (1, tb))                   # (S, tb*D), still tiny

    want_dropout = bool(train) and p > 0.0
    row_bytes = lane * (2 * itemsize + (4 if want_dropout else 0))   # x + out (+ bits) per row
    ts = _pick_seq_tile(S, row_bytes, sublane)
    grid = (S // ts, n_lane_blocks)                    # inner axis: batch chunks -> pe stays resident

    x_spec = pl.BlockSpec((ts, lane), lambda i, j: (i, j))
    pe_spec = pl.BlockSpec((ts, lane), lambda i, j: (i, 0))   # constant over j => no re-DMA
    out_spec = pl.BlockSpec((ts, lane), lambda i, j: (i, j))

    n = S * B * D
    compiler_params = pltpu.CompilerParams(
        dimension_semantics=("parallel", "parallel"))

    if want_dropout:
        # Tiling-independent dropout bits, generated once in the wrapper.
        bits = jax.random.bits(jax.random.PRNGKey(seed), (S, B * D), dtype=jnp.uint32)
        kernel = functools.partial(_add_pe_dropout_kernel, p=float(p))
        out2 = pl.pallas_call(
            kernel,
            out_shape=jax.ShapeDtypeStruct((S, B * D), dtype),
            grid=grid,
            in_specs=[x_spec, pe_spec, pl.BlockSpec((ts, lane), lambda i, j: (i, j))],
            out_specs=out_spec,
            compiler_params=compiler_params,
            cost_estimate=pl.CostEstimate(
                flops=3 * n, transcendentals=0,
                bytes_accessed=2 * n * itemsize + S * lane * itemsize + n * 4),
        )(x2, pe2, bits)
    else:
        out2 = pl.pallas_call(
            _add_pe_kernel,
            out_shape=jax.ShapeDtypeStruct((S, B * D), dtype),
            grid=grid,
            in_specs=[x_spec, pe_spec],
            out_specs=out_spec,
            compiler_params=compiler_params,
            cost_estimate=pl.CostEstimate(
                flops=n, transcendentals=0,
                bytes_accessed=2 * n * itemsize + S * lane * itemsize),
        )(x2, pe2)

    return out2.reshape(S, B, D)


if __name__ == "__main__":
    # Small shapes consistent with the module: seq=8, batch=2, d_model=64, maxlen=16.
    # (batch=2 folds with d_model=64 into a 128-lane-dense block.)
    S, B, D, MAXLEN, P = 8, 2, 64, 16, 0.1

    key = jax.random.PRNGKey(0)
    x = jax.random.normal(key, (S, B, D), dtype=jnp.float32)

    pe = make_pos_encoding(D, MAXLEN)                  # deterministic "parameter" buffer

    # Eval mode (dropout = identity): exact semantic match vs reference.
    out_eval = jax.block_until_ready(positional_encoder(x, pe, p=P, train=False))
    ref = x + pe[:S]                                   # broadcast (S,1,D) over batch
    assert out_eval.shape == (S, B, D)
    assert jnp.allclose(out_eval, ref, atol=1e-6), "eval-mode mismatch vs reference"

    # Train mode: inverted dropout.  Every element must be either 0 or ref/(1-p).
    out_train = jax.block_until_ready(positional_encoder(x, pe, p=P, train=True, seed=1234))
    assert out_train.shape == (S, B, D)
    ok = jnp.isclose(out_train, ref / (1.0 - P), atol=1e-5, rtol=1e-5) | (out_train == 0.0)
    assert bool(jnp.all(ok)), "train-mode output not in {0, scaled(x+pe)}"

    print("KERNEL_OK")
</pallas_src>

<mosaic_0001>
module attributes {stable_mosaic.version = 11 : i64} {
  func.func @_add_pe_kernel(%arg0: i32, %arg1: i32, %arg2: memref<8x128xf32, #tpu.memory_space<vmem>>, %arg3: memref<8x128xf32, #tpu.memory_space<vmem>>, %arg4: memref<8x128xf32, #tpu.memory_space<vmem>>) attributes {dimension_semantics = [#tpu.dimension_semantics<parallel>, #tpu.dimension_semantics<parallel>], iteration_bounds = array<i64: 1, 1>, scalar_prefetch = 0 : i64, scratch_operands = 0 : i64, tpu.core_type = #tpu.core_type<tc>, window_params = [{transform_indices = @transform_0, window_bounds = array<i64: 8, 128>}, {transform_indices = @transform_1, window_bounds = array<i64: 8, 128>}, {transform_indices = @transform_2, window_bounds = array<i64: 8, 128>}]} {
    %c0 = arith.constant 0 : index
    %c0_0 = arith.constant 0 : index
    %0 = vector.load %arg2[%c0, %c0_0] : memref<8x128xf32, #tpu.memory_space<vmem>>, vector<8x128xf32>
    %c0_1 = arith.constant 0 : index
    %c0_2 = arith.constant 0 : index
    %1 = vector.load %arg3[%c0_1, %c0_2] : memref<8x128xf32, #tpu.memory_space<vmem>>, vector<8x128xf32>
    %2 = arith.addf %0, %1 : vector<8x128xf32>
    %c0_3 = arith.constant 0 : index
    %c0_4 = arith.constant 0 : index
    %3 = vector.load %arg4[%c0_3, %c0_4] : memref<8x128xf32, #tpu.memory_space<vmem>>, vector<8x128xf32>
    tpu.vector_store %arg4[%c0_3, %c0_4], %2 {strides = array<i32>} : memref<8x128xf32, #tpu.memory_space<vmem>>, vector<8x128xf32>,
    return
  }
  func.func @transform_0(%arg0: i32, %arg1: i32) -> (i32, i32) {
    %c0_i32 = arith.constant 0 : i32
    return %arg0, %arg1 : i32, i32
  }
  func.func @transform_1(%arg0: i32, %arg1: i32) -> (i32, i32) {
    %c0_i32 = arith.constant 0 : i32
    %c0_i32_0 = arith.constant 0 : i32
    return %arg0, %c0_i32 : i32, i32
  }
  func.func @transform_2(%arg0: i32, %arg1: i32) -> (i32, i32) {
    %c0_i32 = arith.constant 0 : i32
    return %arg0, %arg1 : i32, i32
  }
}

</mosaic_0001>

<bundles_post_ra>
// kernel: tpu_custom_call.1
= control target key start
LH: loop header
LB: loop body
LE: loop exit
PB: predicated region body
PF: predicated region fallthrough
CT: control target
= control target key end

     0   :  { %7 = vsyncpa [#allocation3], 0  ;;  %s170_s0 = inlined_call_operand.hbm [shape: f32[8,128], index: 0, kind: input, shape index: {}]   ;;  %s171_s1 = inlined_call_operand.hbm [shape: f32[8,128], index: 1, kind: input, shape index: {}]   ;;  %s172_s2 = inlined_call_operand.hbm [shape: f32[8,128], index: 2, kind: output, shape index: {}]  }
   0x1   :  { %8 = vsyncpa [#allocation6], 0 }
   0x2   :  { %9 = vsyncpa [#allocation4], 0  ;;  %s15_s11 = sshll.u32 %s170_s0, 4  ;;  %s143_s12 = smov [#allocation2]   ;;  %s16_s11 = int_to_ptr.hbm [resolvable:$true] %s15_s11 }
   0x3   :  { %s17_s13 = sshll.u32 %s143_s12, 4  ;;  %s26_s16 = sshll.u32 %s171_s1, 4  ;;  %s18_s13 = int_to_ptr.vmem [resolvable:$true] %s17_s13  ;;  %s27_s16 = int_to_ptr.hbm [resolvable:$true] %s26_s16 }
   0x4   :  { %20 = dma.hbm_to_vmem [thread:$0]  %s16_s11, 128, %s18_s13, [#allocation3]  }
   0x5   :  { %s144_s17 = smov [#allocation5]  }
   0x6   :  { %s28_s18 = sshll.u32 %s144_s17, 4  ;;  %s29_s18 = int_to_ptr.vmem [resolvable:$true] %s28_s18 }
   0x7   :  { %31 = dma.hbm_to_vmem [thread:$0]  %s27_s16, 128, %s29_s18, [#allocation6]  }
   0x8   :  { %137 = dma.done.wait [#allocation3], 128  }
   0x9   :  { %138 = vsyncadd [#allocation3], 4294967168 }
   0xa   :  { %139 = dma.done.wait [#allocation6], 128  }
   0xb   :  { %140 = vsyncadd [#allocation6], 4294967168  ;;  %s145_s19 = smov [#allocation7]   ;;  %s51_s22 = sshll.u32 %s172_s2, 4  ;;  %v40_v0 = vld [vmem:[#allocation2] sm:$0xff]  ;;  %v41_v1 = vld [vmem:[#allocation5] sm:$0xff]  ;;  %s52_s22 = int_to_ptr.hbm [resolvable:$true] %s51_s22 }
   0xc   :  { %s49_s0 = sshll.u32 %s145_s19, 4  ;;  %v42_v2 = vadd.f32 %v41_v1, %v40_v0  ;;  %s50_s0 = int_to_ptr.vmem [resolvable:$true] %s49_s0 }
   0xe   :  { %43 = vst [vmem:[#allocation7] sm:$0xff] %v42_v2 }
   0xf   :  { %54 = dma.vmem_to_hbm [thread:$0]  %s50_s0, 128, %s52_s22, [#allocation4]  }
  0x10   :  { %141 = dma.done.wait [#allocation4], 128  }
  0x11   :  { %142 = vsyncadd [#allocation4], 4294967168 }
  0x12   :  { %59 = vsyncpa [#allocation3], 1 }
  0x13   :  { %60 = vsyncpa [#allocation6], 1 }
  0x14   :  { %61 = vsyncpa [#allocation4], 1 }

</bundles_post_ra>
